<compile_context>
chip_gen: v6e
topology: v6e:2x2x1
jax: 0.10.0
libtpu: 0.0.40
codegen_flags: <defaults>
</compile_context>

<pallas_src>
import math

import numpy as np
import jax
import jax.numpy as jnp
from jax import lax
from jax.experimental import pallas as pl
from jax.experimental.pallas import tpu as pltpu


# ----------------------------------------------------------------------------
# Parameter setup (plain JAX) -- mirrors VisionRotaryEmbedding.__init__
# with freqs_for='lang', theta=10000.
# ----------------------------------------------------------------------------
def build_rope_freqs(dim, pt_seq_len, ft_seq_len=None, theta=10000.0):
    if ft_seq_len is None:
        ft_seq_len = pt_seq_len
    freqs = 1.0 / theta ** (
        jnp.arange(0, dim, 2)[: dim // 2].astype(jnp.float32) / dim
    )
    t = jnp.arange(ft_seq_len, dtype=jnp.float32) / ft_seq_len * pt_seq_len
    fh = t[:, None] * freqs[None, :]               # (S, dim//2)
    fh = jnp.repeat(fh, 2, axis=-1)                # '... n -> ... (n r)', r=2
    S = ft_seq_len
    freqs_hw = jnp.concatenate(
        [
            jnp.broadcast_to(fh[:, None, :], (S, S, dim)),   # height freqs
            jnp.broadcast_to(fh[None, :, :], (S, S, dim)),   # width  freqs
        ],
        axis=-1,
    )                                              # (S, S, 2*dim)
    return jnp.cos(freqs_hw), jnp.sin(freqs_hw)


# ----------------------------------------------------------------------------
# Pallas kernel
#   out[..., j] = t[..., j]*cos[j] + t[..., j+1]*sinA[j] + t[..., j-1]*sinB[j]
# cos is padded to 1 and sinA/sinB to 0 outside the rotated range, with the
# rotate_half sign / pair parity baked into sinA (= -sin on first-of-pair
# lanes) and sinB (= +sin on second-of-pair lanes).
# ----------------------------------------------------------------------------
def _rope_kernel(cos_ref, sina_ref, sinb_ref, t_ref, o_ref):
    # Roll wrap-around safety: the rolls wrap lane 0 <-> lane lanes-1, but
    # sinA is zero on every lane whose right neighbour (j+1) would cross a
    # rotation-pair / packed-position boundary, and sinB is zero on every lane
    # whose left neighbour (j-1) would (including lane 0).  This is guaranteed
    # by `rot_dim % 2 == 0` and `start_index + rot_dim <= head_dim`, both
    # asserted in the wrapper.
    cos = cos_ref[...]                       # (pr_blk, lanes), f32
    sina = sina_ref[...]
    sinb = sinb_ref[...]
    lanes = cos.shape[-1]
    bh_blk = t_ref.shape[0]

    def apply(t2d):                          # (pr_blk, lanes) -> (pr_blk, lanes)
        t = t2d.astype(jnp.float32)
        t_next = pltpu.roll(t, lanes - 1, 1)   # y[:, j] = t[:, j+1]   (XLU)
        t_prev = pltpu.roll(t, 1, 1)           # y[:, j] = t[:, j-1]   (XLU)
        return (t * cos + t_next * sina + t_prev * sinb).astype(o_ref.dtype)

    if bh_blk == 1:
        o_ref[0] = apply(t_ref[0])
    else:
        def body(s, carry):
            o_ref[s] = apply(t_ref[s])
            return carry
        lax.fori_loop(0, bh_blk, body, 0)


# ----------------------------------------------------------------------------
# Wrapper-side table construction / block sizing
# ----------------------------------------------------------------------------
def _build_padded_tables(freqs_cos, freqs_sin, d, start_index, lp):
    """(S, S, R) cos/sin -> three (pr, lp*d) f32 tables, sign-baked & padded."""
    S = freqs_cos.shape[0]
    R = freqs_cos.shape[-1]
    p = S * S
    end = start_index + R
    cos2 = freqs_cos.reshape(p, R).astype(jnp.float32)
    sin2 = freqs_sin.reshape(p, R).astype(jnp.float32)
    even = (jnp.arange(R) % 2) == 0            # first-of-pair lanes (relative)
    cos_full = jnp.ones((p, d), jnp.float32).at[:, start_index:end].set(cos2)
    sina_full = jnp.zeros((p, d), jnp.float32).at[:, start_index:end].set(
        jnp.where(even, -sin2, 0.0))           # multiplies t[:, j+1]
    sinb_full = jnp.zeros((p, d), jnp.float32).at[:, start_index:end].set(
        jnp.where(even, 0.0, sin2))            # multiplies t[:, j-1]
    pr = p // lp
    lanes = lp * d
    return (cos_full.reshape(pr, lanes),
            sina_full.reshape(pr, lanes),
            sinb_full.reshape(pr, lanes))


def _divisors(n):
    ds = set()
    for i in range(1, int(math.isqrt(n)) + 1):
        if n % i == 0:
            ds.add(i)
            ds.add(n // i)
    return sorted(ds)


def _sublane_multiple(dtype):
    """Rows per packed sublane tile: 8 (32-bit), 16 (16-bit), 32 (8-bit)."""
    return max(8, 32 // jnp.dtype(dtype).itemsize)


def _pick_blocks(bh, pr, row_bytes, target_bytes, sublane_mult, min_steps=4):
    """Pick (bh_blk, pr_blk) with bh_blk | bh, pr_blk | pr and pr_blk either a
    sublane-tile multiple or the full extent, preferring in order:
      (a) >= min_steps total grid steps (v7x: keep both TCs busy & pipelined),
      (b) blocks that fit target_bytes,
      (c) the biggest such block (amortise per-step overhead),
      (d) whole-spatial-plane row blocks (table block constant per grid row).
    """
    best_key, best = None, None
    for bh_blk in _divisors(bh):
        for pr_blk in _divisors(pr):
            if pr_blk != pr and pr_blk % sublane_mult != 0:
                continue
            steps = (bh // bh_blk) * (pr // pr_blk)
            blk_bytes = bh_blk * pr_blk * row_bytes
            fits = blk_bytes <= target_bytes
            key = (min(steps, min_steps), fits,
                   blk_bytes if fits else -blk_bytes,
                   pr_blk == pr)
            if best_key is None or key > best_key:
                best_key, best = key, (bh_blk, pr_blk)
    return best


def vision_rope_forward(t, freqs_cos, freqs_sin, start_index=0,
                        *, target_block_bytes=2 << 20, min_grid_steps=4):
    """Apply EVA-02 2D RoPE.  t: (..., S, S, D); freqs_cos/sin: (S, S, rot_dim)."""
    S, S2, rot_dim = freqs_cos.shape
    assert S == S2
    *lead, s1, s2, d = t.shape
    assert s1 == S and s2 == S
    end_index = start_index + rot_dim
    # These invariants also guarantee the wrap-around lanes of the in-kernel
    # rolls always hit a zero sin entry (see _rope_kernel docstring).
    assert end_index <= d, "head_dim too small for rot_dim at this start_index"
    assert rot_dim % 2 == 0

    bh = int(np.prod(lead)) if lead else 1
    p = S * S

    # Lane packing: fold lp consecutive spatial positions into the lane dim so
    # the stored last dim is a multiple of 128 (free contiguous reshape).
    # lp0 = 128/gcd(d,128) is the only lane-multiple-preserving fold; if it
    # does not divide p no fold can (p*d % 128 == 0  <=>  p % lp0 == 0), so we
    # fall back to lanes = d (full-extent last dim: layout-legal, but masked
    # partial stores when d % 128 != 0).
    lp = 128 // math.gcd(d, 128)
    if p % lp != 0:
        # TODO(synk): pad the spatial axis to a multiple of lp if masked
        # stores ever show up hot for these (rare) shapes.
        lp = 1
    pr = p // lp
    lanes = lp * d

    cos_p, sina_p, sinb_p = _build_padded_tables(
        freqs_cos, freqs_sin, d, start_index, lp)

    t3 = t.reshape(bh, pr, lanes)            # contiguous view, no copy

    row_bytes = lanes * t.dtype.itemsize
    bh_blk, pr_blk = _pick_blocks(
        bh, pr, row_bytes, target_block_bytes,
        _sublane_multiple(t.dtype), min_grid_steps)
    pr_steps = pr // pr_blk
    bh_steps = bh // bh_steps if False else bh // bh_blk  # (keep simple)

    table_spec = pl.BlockSpec((pr_blk, lanes), lambda j, i: (j, 0))
    act_spec = pl.BlockSpec((bh_blk, pr_blk, lanes), lambda j, i: (i, j, 0))

    out = pl.pallas_call(
        _rope_kernel,
        out_shape=jax.ShapeDtypeStruct((bh, pr, lanes), t.dtype),
        # bh is the innermost grid axis -> the tiny table blocks keep the same
        # block index across the inner sweep and are not re-DMA'd.
        grid=(pr_steps, bh_steps),
        in_specs=[table_spec, table_spec, table_spec, act_spec],
        out_specs=act_spec,
        compiler_params=pltpu.CompilerParams(
            dimension_semantics=("parallel", "parallel")),
    )(cos_p, sina_p, sinb_p, t3)

    return out.reshape(t.shape)


# ----------------------------------------------------------------------------
# Pure-JAX reference (for verification)
# ----------------------------------------------------------------------------
def _rotate_half_ref(x):
    xr = x.reshape(*x.shape[:-1], -1, 2)
    x1, x2 = xr[..., 0], xr[..., 1]
    return jnp.stack([-x2, x1], axis=-1).reshape(x.shape)


def vision_rope_ref(t, cos, sin, start_index=0):
    rot_dim = cos.shape[-1]
    end_index = start_index + rot_dim
    t_left = t[..., :start_index]
    t_mid = t[..., start_index:end_index]
    t_right = t[..., end_index:]
    t_mid = t_mid * cos + _rotate_half_ref(t_mid) * sin
    return jnp.concatenate([t_left, t_mid, t_right], axis=-1)


if __name__ == "__main__":
    # RoPE tables: per-axis half-dim 16 -> rot_dim = 32, spatial grid 8x8.
    dim, pt_seq_len, ft_seq_len = 16, 8, 8
    S = ft_seq_len
    freqs_cos, freqs_sin = build_rope_freqs(dim, pt_seq_len, ft_seq_len)

    # Config 1: f32, head_dim 48, rotated slice offset by 8 (pads both sides).
    B, H, D = 2, 2, 48
    t1 = jax.random.normal(jax.random.PRNGKey(0), (B, H, S, S, D), jnp.float32)
    out1 = jax.block_until_ready(
        vision_rope_forward(t1, freqs_cos, freqs_sin, start_index=8))
    ref1 = vision_rope_ref(t1, freqs_cos, freqs_sin, start_index=8)
    np.testing.assert_allclose(np.asarray(out1), np.asarray(ref1),
                               rtol=1e-5, atol=1e-5)

    # Config 2: bf16 activations, rotation covers the whole head_dim
    # (exercises the 16-row bf16 sublane rule and f32-compute/bf16-store).
    B2, H2, D2 = 1, 3, 32
    t2 = jax.random.normal(jax.random.PRNGKey(1), (B2, H2, S, S, D2),
                           jnp.bfloat16)
    out2 = jax.block_until_ready(
        vision_rope_forward(t2, freqs_cos, freqs_sin, start_index=0))
    ref2 = vision_rope_ref(t2.astype(jnp.float32), freqs_cos, freqs_sin,
                           start_index=0)
    np.testing.assert_allclose(np.asarray(out2).astype(np.float32),
                               np.asarray(ref2), rtol=2e-2, atol=2e-2)

    # Config 3: larger batch*heads so the picker chooses bh_blk > 1 and the
    # in-kernel fori_loop over slabs is exercised.
    B3, H3, D3 = 4, 4, 64
    t3 = jax.random.normal(jax.random.PRNGKey(2), (B3, H3, S, S, D3),
                           jnp.float32)
    out3 = jax.block_until_ready(
        vision_rope_forward(t3, freqs_cos, freqs_sin, start_index=16))
    ref3 = vision_rope_ref(t3, freqs_cos, freqs_sin, start_index=16)
    np.testing.assert_allclose(np.asarray(out3), np.asarray(ref3),
                               rtol=1e-5, atol=1e-5)

    print("KERNEL_OK")
</pallas_src>

<mosaic_0001>
module attributes {stable_mosaic.version = 11 : i64} {
  func.func @_rope_kernel(%arg0: i32, %arg1: i32, %arg2: memref<8x384xf32, #tpu.memory_space<vmem>>, %arg3: memref<8x384xf32, #tpu.memory_space<vmem>>, %arg4: memref<8x384xf32, #tpu.memory_space<vmem>>, %arg5: memref<1x8x384xf32, #tpu.memory_space<vmem>>, %arg6: memref<1x8x384xf32, #tpu.memory_space<vmem>>) attributes {dimension_semantics = [#tpu.dimension_semantics<parallel>, #tpu.dimension_semantics<parallel>], iteration_bounds = array<i64: 1, 4>, scalar_prefetch = 0 : i64, scratch_operands = 0 : i64, tpu.core_type = #tpu.core_type<tc>, window_params = [{transform_indices = @transform_0, window_bounds = array<i64: 8, 384>}, {transform_indices = @transform_1, window_bounds = array<i64: 8, 384>}, {transform_indices = @transform_2, window_bounds = array<i64: 8, 384>}, {transform_indices = @transform_3, window_bounds = array<i64: 1, 8, 384>}, {transform_indices = @transform_4, window_bounds = array<i64: 1, 8, 384>}]} {
    %c0 = arith.constant 0 : index
    %c0_0 = arith.constant 0 : index
    %0 = vector.load %arg2[%c0, %c0_0] : memref<8x384xf32, #tpu.memory_space<vmem>>, vector<8x384xf32>
    %c0_1 = arith.constant 0 : index
    %c0_2 = arith.constant 0 : index
    %1 = vector.load %arg3[%c0_1, %c0_2] : memref<8x384xf32, #tpu.memory_space<vmem>>, vector<8x384xf32>
    %c0_3 = arith.constant 0 : index
    %c0_4 = arith.constant 0 : index
    %2 = vector.load %arg4[%c0_3, %c0_4] : memref<8x384xf32, #tpu.memory_space<vmem>>, vector<8x384xf32>
    %c0_5 = arith.constant 0 : index
    %c0_6 = arith.constant 0 : index
    %c0_7 = arith.constant 0 : index
    %3 = vector.load %arg5[%c0_5, %c0_6, %c0_7] : memref<1x8x384xf32, #tpu.memory_space<vmem>>, vector<1x8x384xf32>
    %4 = vector.shape_cast %3 : vector<1x8x384xf32> to vector<8x384xf32>
    %c383_i32 = arith.constant 383 : i32
    %5 = tpu.dynamic_rotate %4 by %c383_i32 dim 1 : vector<8x384xf32>, i32 -> vector<8x384xf32>
    %c1_i32 = arith.constant 1 : i32
    %6 = tpu.dynamic_rotate %4 by %c1_i32 dim 1 : vector<8x384xf32>, i32 -> vector<8x384xf32>
    %7 = arith.mulf %4, %0 : vector<8x384xf32>
    %8 = arith.mulf %5, %1 : vector<8x384xf32>
    %9 = arith.addf %7, %8 : vector<8x384xf32>
    %10 = arith.mulf %6, %2 : vector<8x384xf32>
    %11 = arith.addf %9, %10 : vector<8x384xf32>
    %c0_8 = arith.constant 0 : index
    %c0_9 = arith.constant 0 : index
    %c0_10 = arith.constant 0 : index
    %12 = vector.load %arg6[%c0_8, %c0_9, %c0_10] : memref<1x8x384xf32, #tpu.memory_space<vmem>>, vector<1x8x384xf32>
    %13 = vector.shape_cast %12 : vector<1x8x384xf32> to vector<8x384xf32>
    %14 = vector.shape_cast %11 : vector<8x384xf32> to vector<1x8x384xf32>
    tpu.vector_store %arg6[%c0_8, %c0_9, %c0_10], %14 {strides = array<i32>} : memref<1x8x384xf32, #tpu.memory_space<vmem>>, vector<1x8x384xf32>,
    return
  }
  func.func @transform_0(%arg0: i32, %arg1: i32) -> (i32, i32) {
    %c0_i32 = arith.constant 0 : i32
    %c0_i32_0 = arith.constant 0 : i32
    return %arg0, %c0_i32 : i32, i32
  }
  func.func @transform_1(%arg0: i32, %arg1: i32) -> (i32, i32) {
    %c0_i32 = arith.constant 0 : i32
    %c0_i32_0 = arith.constant 0 : i32
    return %arg0, %c0_i32 : i32, i32
  }
  func.func @transform_2(%arg0: i32, %arg1: i32) -> (i32, i32) {
    %c0_i32 = arith.constant 0 : i32
    %c0_i32_0 = arith.constant 0 : i32
    return %arg0, %c0_i32 : i32, i32
  }
  func.func @transform_3(%arg0: i32, %arg1: i32) -> (i32, i32, i32) {
    %c0_i32 = arith.constant 0 : i32
    %c0_i32_0 = arith.constant 0 : i32
    return %arg1, %arg0, %c0_i32 : i32, i32, i32
  }
  func.func @transform_4(%arg0: i32, %arg1: i32) -> (i32, i32, i32) {
    %c0_i32 = arith.constant 0 : i32
    %c0_i32_0 = arith.constant 0 : i32
    return %arg1, %arg0, %c0_i32 : i32, i32, i32
  }
}

</mosaic_0001>

<bundles_post_ra>
// kernel: tpu_custom_call.1
= control target key start
LH: loop header
LB: loop body
LE: loop exit
PB: predicated region body
PF: predicated region fallthrough
CT: control target
= control target key end

     0   :  { %s1027_s0 = inlined_call_operand.hbm [shape: f32[8,384], index: 0, kind: input, shape index: {}]   ;;  %s1028_s1 = inlined_call_operand.hbm [shape: f32[8,384], index: 1, kind: input, shape index: {}]   ;;  %s1029_s2 = inlined_call_operand.hbm [shape: f32[8,384], index: 2, kind: input, shape index: {}]   ;;  %s1030_s3 = inlined_call_operand.hbm [shape: f32[4,8,384], index: 3, kind: input, shape index: {}]   ;;  %s1031_s4 = inlined_call_operand.hbm [shape: f32[4,8,384], index: 4, kind: output, shape index: {}]  }
   0x1   :  { %1036 = sst [smem:[#allocation15_spill]] %s1027_s0 }
   0x2   :  { %1037 = sst [smem:[#allocation16_spill]] %s1028_s1 }
   0x3   :  { %9 = vsyncpa [#allocation3], 0 }
   0x4   :  { %10 = vsyncpa [#allocation6], 0 }
   0x5   :  { %11 = vsyncpa [#allocation9], 0 }
   0x6   :  { %13 = vsyncpa [#allocation9 + $0x1], 0 }
   0x7   :  { %14 = vsyncpa [#allocation4], 0 }
   0x8   :  { %16 = vsyncpa [#allocation4 + $0x1], 0  ;;  %s826_s15 = smov 0   ;;  %s828_s16 = smov 0  }
   0x9   :  { %s830_s17 = smov 0   ;;  %s832_s18 = smov 0  }
   0xa   :  { %s834_s19 = smov 0   ;;  %s836_s20 = smov 0  }
   0xb LB: > { %s484_s21 = sadd.s32 4294967295, %s792_s20   ;;  %s485_s22 = sadd.s32 4294967294, %s792_s20   ;;  %s792_s20 = sphi %s836_s20, %s22_s20   ;;  %s788_s19 = sphi %s834_s19, %s1057_s19   ;;  %s784_s18 = sphi %s832_s18, %s1056_s18   ;;  %s780_s17 = sphi %s830_s17, %s1055_s17   ;;  %s776_s16 = sphi %s828_s16, %s1054_s16   ;;  %s772_s15 = sphi %s826_s15, %s1053_s15  }
   0xc   : > { %p134_p0 = scmp.ne.s32.totalorder %s776_s16, %s772_s15  ;;  %p860_p1 = scmp.eq.s32.totalorder %s484_s21, 0 }
   0xd   : > { %p864_p2 = scmp.eq.s32.totalorder %s484_s21, 3  ;;  %p166_p3 = scmp.eq.s32.totalorder %s485_s22, 3 }
   0xe   : > { %s1038_s23 = scalar_select %p860_p1, 1, 0 }
   0xf   : > { %s1039_s24 = scalar_select %p864_p2, 1, 0 }
  0x10   : > { %p870_p4 = por %p860_p1, %p134_p0  ;;  %p486_p5 = scmp.ge.s32.totalorder %s792_s20, 1 }
  0x11   : > { %p875_p6 = por %p166_p3, %p134_p0  ;;  %p173_p7 = scmp.lt.s32.totalorder %s792_s20, 5 }
  0x12   : > { %s1040_s25 = scalar_select %p870_p4, 1, 0 }
  0x13   : > { %s1041_s26 = scalar_select %p875_p6, 1, 0 }
  0x14   : > { %p880_p8 = pnand %p486_p5, %p173_p7  ;;  %s794_s28 = smov [#allocation5]  }
  0x15   : > { %s203_s29 = sshll.u32 %s794_s28, 4  ;;  %s795_s5 = smov [#allocation2]   ;;  %s204_s29 = int_to_ptr.vmem [resolvable:$true] %s203_s29 }
  0x16   : > { %s1042_s27 = scalar_select %p880_p8, 1, 0 }
  0x17   : > { %p519_p9 = pneg %p880_p8  ;;  %s189_s6 = sshll.u32 %s795_s5, 4  ;;  %s190_s6 = int_to_ptr.vmem [resolvable:$true] %s189_s6 }
  0x18   : > { %s796_s7 = smov [#allocation7]   ;;  %s609_s9 = scalar_lea.vmem %s204_s29, 384 }
  0x19   : > { %p888_p10 = pnand %p519_p9, %p860_p1  ;;  %s217_s8 = sshll.u32 %s796_s7, 4  ;;  %s218_s8 = int_to_ptr.vmem [resolvable:$true] %s217_s8 }
  0x1a   : > { %p610_p12 = scmp.ne.s32.totalorder %s204_s29, %s609_s9  ;;  %p617_p3 = scmp.lt.s32.totalorder %s204_s29, %s204_s29 }
  0x1b   : > { %p600_p11 = pneg %p888_p10  ;;  %p618_p5 = scmp.lt.s32.totalorder %s609_s9, %s609_s9 }
  0x1d   : > { %p612_p13 = pnand %p610_p12, %p600_p11  ;;  %p619_p7 = por %p618_p5, %p617_p3 }
  0x1f   : > { %p613_p0 = pneg %p612_p13 }
  0x21   : > { %p620_p9 = pnand %p619_p7, %p613_p0 }
  0x23   : > { %623 = shalt.err (!%p620_p9)
}
  0x24   : > { %s1044_s1 = sld [smem:[#allocation16_spill]]  ;;  %s635_s12 = scalar_lea.vmem %s190_s6, 384 }
  0x25   : > { %p636_p6 = scmp.ne.s32.totalorder %s190_s6, %s635_s12  ;;  %p643_p12 = scmp.lt.s32.totalorder %s190_s6, %s190_s6 }
  0x26   : > { %p644_p13 = scmp.lt.s32.totalorder %s635_s12, %s635_s12 }
  0x27   : > { %p638_p4 = pnand %p636_p6, %p600_p11 }
  0x28   : > { %p645_p8 = por %p644_p13, %p643_p12 }
  0x29   : > { %p639_p1 = pneg %p638_p4 }
  0x2a   : > { %525 = dma.hbm_to_vmem [thread:$0]  (!%p888_p10), %s1044_s1, 384, %s204_s29, [#allocation6]  }
  0x2b   : > { %p646_p2 = pnand %p645_p8, %p639_p1 }
  0x2d   : > { %649 = shalt.err (!%p646_p2)
}
  0x2e   : > { %s1045_s0 = sld [smem:[#allocation15_spill]]  ;;  %s661_s21 = scalar_lea.vmem %s218_s8, 384 }
  0x2f   : > { %p662_p0 = scmp.ne.s32.totalorder %s218_s8, %s661_s21  ;;  %p669_p4 = scmp.lt.s32.totalorder %s218_s8, %s218_s8 }
  0x30   : > { %p670_p5 = scmp.lt.s32.totalorder %s661_s21, %s661_s21 }
  0x31   : > { %p664_p3 = pnand %p662_p0, %p600_p11 }
  0x32   : > { %p671_p7 = por %p670_p5, %p669_p4 }
  0x33   : > { %p665_p6 = pneg %p664_p3 }
  0x34   : > { %522 = dma.hbm_to_vmem [thread:$0]  (!%p888_p10), %s1045_s0, 384, %s190_s6, [#allocation3]  }
  0x35   : > { %p672_p9 = pnand %p671_p7, %p665_p6 }
  0x37   : > { %675 = shalt.err (!%p672_p9)
}
  0x38   : > { %528 = dma.hbm_to_vmem [thread:$0]  (!%p888_p10), %s1029_s2, 384, %s218_s8, [#allocation6]  }
  0x39   : > { %s121_s29 = sadd.s32 1, %s780_s17  ;;  %s31_s5 = sadd.s32 1, %s788_s19 }
  0x3a   : > { %p128_p1 = scmp.ne.s32.totalorder %s780_s17, %s776_s16  ;;  %p32_p2 = scmp.ge.s32.totalorder %s31_s5, 4 }
  0x3b   : > { %p129_p8 = scmp.eq.s32.totalorder %s792_s20, 0  ;;  %p1046_p11 = scmp.ne.s32.totalorder %s1039_s24, 0 }
  0x3c   : > { %p540_p13 = scmp.lt.s32.totalorder %s792_s20, 4  ;;  %s1059_s5 = smov (%p32_p2, %s31_s5), 0 }
  0x3d   : > { %p925_p12 = por %p1046_p11, %p128_p1  ;;  %p130_p0 = por %p129_p8, %p128_p1 }
  0x3e   : > { %s228_s6 = sand.u32 1, %s780_s17   ;;  %s116_s7 = ssub.s32 %s788_s19, %s1059_s5 }
  0x3f   : > { %p119_p3 = scmp.eq.s32.totalorder %s116_s7, 0  ;;  %s499_s8 = smul.u32 24, %s228_s6 }
  0x40   : > { %s500_s9 = smul.u32 384, %s788_s19  ;;  %p936_p10 = pnand %p540_p13, %p130_p0 }
  0x41   : > { %s941_s24 = scalar_select %p119_p3, %s780_s17, %s121_s29  }
  0x42   : > { %s240_s13 = scalar_lea.hbm %s1030_s3, %s500_s9  ;;  %s232_s14 = scalar_lea.vmem [#allocation8], %s499_s8 }
  0x43   : > { %s242_s21 = sshll.u32 %s232_s14, 4  ;;  %s229_s22 = scalar_lea.sflag [#allocation9], %s228_s6  ;;  %s243_s21 = int_to_ptr.vmem [resolvable:$true] %s242_s21 }
  0x44   : > { %p678_p6 = pneg %p936_p10  ;;  %s689_s28 = scalar_lea.vmem %s243_s21, 384 }
  0x45   : > { %p690_p4 = scmp.ne.s32.totalorder %s243_s21, %s689_s28  ;;  %s797_s7 = smov [#allocation8]  }
  0x46   : > { %s694_s0 = sshll.u32 %s797_s7, 4  ;;  %s695_s0 = int_to_ptr.vmem [resolvable:$false] %s694_s0 }
  0x47   : > { %p692_p5 = pnand %p690_p4, %p678_p6  ;;  %s696_s1 = scalar_lea.vmem %s695_s0, 768 }
  0x48   : > { %p697_p9 = scmp.lt.s32.totalorder %s243_s21, %s695_s0  ;;  %p698_p1 = scmp.lt.s32.totalorder %s696_s1, %s689_s28 }
  0x49   : > { %p693_p7 = pneg %p692_p5 }
  0x4a   : > { %p699_p2 = por %p698_p1, %p697_p9 }
  0x4c   : > { %p700_p8 = pnand %p699_p2, %p693_p7 }
  0x4e   : > { %703 = shalt.err (!%p700_p8)
}
  0x4f   : > { %532 = dma.hbm_to_vmem [thread:$0]  (!%p936_p10), %s240_s13, 384, %s243_s21, %s229_s22  }
  0x50   : > { %p1049_p11 = scmp.ne.s32.totalorder %s1042_s27, 0 }
  0x51   : > { %p1050_p13 = scmp.ne.s32.totalorder (!%p1049_p11), %s1038_s23, 0 }
  0x52   : > { %251 = sbr.rel (%p1049_p11) target bundleno = 238 (0xee), region = 36 }
  0x57   : > { %755 = dma.done.wait (%p1050_p13), [#allocation3], 384  }
  0x58   : > { %757 = vsyncadd (%p1050_p13), [#allocation3], 4294966912 }
  0x59   : > { %759 = dma.done.wait (%p1050_p13), [#allocation6], 768  }
  0x5a   : > { %761 = vsyncadd (%p1050_p13), [#allocation6], 4294966528  ;;  %s961_s0 = sand.u32 1, %s776_s16   ;;  %p1051_p0 = scmp.ne.s32.totalorder %s1040_s25, 0 }
  0x5b   : > { %s501_s1 = smul.u32 24, %s961_s0  ;;  %s266_s27 = scalar_lea.sflag [#allocation9], %s961_s0 }
  0x5d   : > { %s269_s29 = scalar_lea.vmem [#allocation8], %s501_s1 }
  0x5e   : > { %763 = dma.done.wait (%p1051_p0), %s266_s27, 384  }
  0x5f   : > { %765 = vsyncadd (%p1051_p0), %s266_s27, 4294966912  ;;  %v305_v0 = vld [vmem:[%s269_s29 + $0x10] sm:$0xff]  ;;  %v303_v1 = vld [vmem:[%s269_s29] sm:$0xff]  ;;  %s798_s23 = smov 127   ;;  %s799_s6 = smov 1   ;;  %v312_v3 = vlaneseq }
  0x60   : > { %310 = vrot.lane.b32.xlu1 %v305_v0, %s798_s23  ;;  %306 = vrot.lane.b32.xlu0 %v303_v1, %s798_s23  ;;  %v304_v2 = vld [vmem:[%s269_s29 + $0x8] sm:$0xff]  ;;  %v294_v10 = vld [vmem:[#allocation2] sm:$0xff]  ;;  %v297_v12 = vld [vmem:[#allocation5] sm:$0xff]  ;;  %s502_s25 = smul.u32 384, %s784_s18  ;;  %s293_s8 = scalar_lea.vmem [#allocation10], %s501_s1 }
  0x61   : > { %v313_v4 = vand.u32 127, %v312_v3  ;;  %v296_v7 = vld [vmem:[#allocation2 + $0x10] sm:$0xff]  ;;  %v299_v8 = vld [vmem:[#allocation5 + $0x10] sm:$0xff]  ;;  %v298_v13 = vld [vmem:[#allocation5 + $0x8] sm:$0xff]  ;;  %v328_v18 = vmul.f32 %v303_v1, %v294_v10  ;;  %s363_s9 = sshll.u32 %s293_s8, 4  ;;  %s347_s12 = scalar_lea.sflag [#allocation4], %s961_s0  ;;  %s982_s9 = int_to_ptr.vmem [resolvable:$true] %s363_s9 }
  0x62   : > { %v295_v11 = vld [vmem:[#allocation2 + $0x8] sm:$0xff]  ;;  %v330_v14 = vmul.f32 %v305_v0, %v296_v7  ;;  %v300_v24 = vld [vmem:[#allocation7] sm:$0xff]  ;;  %v301_v25 = vld [vmem:[#allocation7 + $0x8] sm:$0xff]  ;;  %s980_s18 = scalar_lea.hbm %s1031_s4, %s502_s25  ;;  %s704_s13 = scalar_lea.vmem %s982_s9, 384 }
  0x63   : > { %vm314_vm0 = vcmp.lt.s32.totalorder %v313_v4, 127  ;;  %v329_v21 = vmul.f32 %v304_v2, %v295_v11  ;;  %vm324_vm1 = vcmp.lt.s32.totalorder %v313_v4, 1  ;;  %v302_v26 = vld [vmem:[#allocation7 + $0x10] sm:$0xff]  ;;  %p705_p3 = scmp.ne.s32.totalorder %s982_s9, %s704_s13  ;;  %s800_s14 = smov [#allocation10]  }
  0x64   : > { %318 = vrot.lane.b32.xlu1 %v303_v1, %s799_s6  ;;  %308 = vrot.lane.b32.xlu0 %v304_v2, %s798_s23  ;;  %s708_s21 = sshll.u32 %s800_s14, 4  ;;  %s709_s21 = int_to_ptr.vmem [resolvable:$false] %s708_s21 }
  0x65   : > { %p706_p10 = pnand %p705_p3, %p925_p12  ;;  %s710_s22 = scalar_lea.vmem %s709_s21, 768 }
  0x66   : > { %p711_p4 = scmp.lt.s32.totalorder %s982_s9, %s709_s21  ;;  %p712_p5 = scmp.lt.s32.totalorder %s710_s22, %s704_s13 }
  0x67   : > { %p707_p6 = pneg %p706_p10 }
  0x68   : > { %322 = vrot.lane.b32.xlu1 %v305_v0, %s799_s6  ;;  %320 = vrot.lane.b32.xlu0 %v304_v2, %s799_s6  ;;  %p713_p7 = por %p712_p5, %p711_p4 }
  0x6a   : > { %p714_p9 = pnand %p713_p7, %p707_p6 }
  0xd2   : > { %v311_v5 = vpop.permute.xlu1 %310  ;;  %v307_v6 = vpop.permute.xlu0 %306 }
  0xd3   : > { %v317_v9 = vsel %vm314_vm0, %v311_v5, %v307_v6 }
  0xd4   : > { %v333_v15 = vmul.f32 %v317_v9, %v299_v8 }
  0xd6   : > { %v319_v16 = vpop.permute.xlu1 %318  ;;  %v309_v17 = vpop.permute.xlu0 %308  ;;  %v336_v27 = vadd.f32 %v333_v15, %v330_v14 }
  0xd7   : > { %v315_v19 = vsel %vm314_vm0, %v309_v17, %v311_v5  ;;  %v316_v20 = vsel %vm314_vm0, %v307_v6, %v309_v17 }
  0xd8   : > { %v331_v22 = vmul.f32 %v316_v20, %v297_v12  ;;  %v332_v23 = vmul.f32 %v315_v19, %v298_v13 }
  0xda   : > { %v323_v28 = vpop.permute.xlu1 %322  ;;  %v321_v29 = vpop.permute.xlu0 %320  ;;  %v334_v30 = vadd.f32 %v331_v22, %v328_v18  ;;  %v335_v34 = vadd.f32 %v332_v23, %v329_v21 }
  0xdb   : > { %v327_v31 = vsel %vm324_vm1, %v323_v28, %v319_v16  ;;  %v325_v32 = vsel %vm324_vm1, %v321_v29, %v323_v28  ;;  %v326_v33 = vsel %vm324_vm1, %v319_v16, %v321_v29 }
  0xdc   : > { %v337_v35 = vmul.f32 %v327_v31, %v300_v24  ;;  %v338_v36 = vmul.f32 %v326_v33, %v301_v25  ;;  %v339_v37 = vmul.f32 %v325_v32, %v302_v26 }
  0xde   : > { %v340_v38 = vadd.f32 %v337_v35, %v334_v30  ;;  %v341_v39 = vadd.f32 %v338_v36, %v335_v34  ;;  %v342_v40 = vadd.f32 %v339_v37, %v336_v27 }
  0xe0   : > { %343 = vst [vmem:[%s293_s8] sm:$0xff] %v340_v38  ;;  %344 = vst [vmem:[%s293_s8 + $0x8] sm:$0xff] %v341_v39 }
  0xe1   : > { %345 = vst [vmem:[%s293_s8 + $0x10] sm:$0xff] %v342_v40 }
  0xe2   : > { %717 = shalt.err (!%p714_p9)
}
  0xe3   : > { %s718_s28 = scalar_lea.hbm %s980_s18, 384  ;;  %s722_s1 = scalar_lea.hbm %s1031_s4, 1536 }
  0xe4   : > { %p719_p1 = scmp.ne.s32.totalorder %s980_s18, %s718_s28  ;;  %p723_p11 = scmp.lt.s32.totalorder %s980_s18, %s1031_s4 }
  0xe5   : > { %p724_p13 = scmp.lt.s32.totalorder %s722_s1, %s718_s28 }
  0xe6   : > { %p720_p2 = pnand %p719_p1, %p925_p12 }
  0xe7   : > { %p725_p0 = por %p724_p13, %p723_p11 }
  0xe8   : > { %p721_p8 = pneg %p720_p2 }
  0xea   : > { %p726_p3 = pnand %p725_p0, %p721_p8 }
  0xec   : > { %729 = shalt.err (!%p726_p3)
}
  0xed   : > { %517 = dma.vmem_to_hbm [thread:$0]  (%p925_p12), %s982_s9, 384, %s980_s18, %s347_s12  }
  0xee PF: > { %p544_p10 = scmp.ge.s32.totalorder %s792_s20, 2  ;;  %s375_s23 = sand.u32 1, %s772_s15  }
  0xef   : > { %p1052_p6 = scmp.ne.s32.totalorder %s1041_s26, 0  ;;  %s376_s6 = scalar_lea.sflag [#allocation4], %s375_s23 }
  0xf1   : > { %p534_p4 = pnand %p544_p10, %p1052_p6 }
  0xf3   : > { %p535_p5 = pneg %p534_p4 }
  0xf5   : > { %767 = dma.done.wait (%p535_p5), %s376_s6, 384  }
  0xf6   : > { %769 = vsyncadd (%p535_p5), %s376_s6, 4294966912  ;;  %s22_s20 = sadd.s32 1, %s792_s20   ;;  %s1053_s15 = smov %s776_s16 }
  0xf7   : > { %p19_p7 = scmp.ge.s32.totalorder %s22_s20, 6   ;;  %s1054_s16 = smov %s780_s17 }
  0xf8   : > { %s1055_s17 = smov %s941_s24  ;;  %s1056_s18 = smov %s788_s19 }
  0xf9   : > { %s1057_s19 = smov %s1059_s5  ;;  %21 = sbr.rel (!%p19_p7) target bundleno = 11 (0xb), region = 97 }
  0xfe   :  { %381 = vsyncpa [#allocation3], 1 }
  0xff   :  { %383 = vsyncpa [#allocation3 + $0x1], 1 }
 0x100   :  { %384 = vsyncpa [#allocation6], 1 }
 0x101   :  { %385 = vsyncpa [#allocation9], 1 }
 0x102   :  { %387 = vsyncpa [#allocation9 + $0x1], 1 }
 0x103   :  { %388 = vsyncpa [#allocation4], 1 }
 0x104   :  { %390 = vsyncpa [#allocation4 + $0x1], 1 }

</bundles_post_ra>
